<compile_context>
chip_gen: v5e
topology: v5e:2x2
jax: 0.10.0
libtpu: 0.0.40
codegen_flags: <defaults>
</compile_context>

<pallas_src>
import jax
import jax.numpy as jnp
from jax.experimental import pallas as pl
from jax.experimental.pallas import tpu as pltpu


def _soft_ce_kernel(x_ref, t_ref, loss_ref, m_sc, s_sc, tsum_sc, txsum_sc):
    """Soft-label cross entropy for a (TR, TC) block, online over class chunks.

    After the last class chunk, for each row r:
        loss[r] = logsumexp(x[r, :]) * sum(t[r, :]) - sum(t[r, :] * x[r, :])
                = sum(-t[r, :] * log_softmax(x[r, :]))   (exact, even for unnormalized t)
    """
    k = pl.program_id(1)
    nk = pl.num_programs(1)

    @pl.when(k == 0)
    def _init():
        m_sc[...] = jnp.full(m_sc.shape, -jnp.inf, jnp.float32)
        s_sc[...] = jnp.zeros(s_sc.shape, jnp.float32)
        tsum_sc[...] = jnp.zeros(tsum_sc.shape, jnp.float32)
        txsum_sc[...] = jnp.zeros(txsum_sc.shape, jnp.float32)

    x = x_ref[...].astype(jnp.float32)  # (TR, TC)
    t = t_ref[...].astype(jnp.float32)  # (TR, TC)

    # Online (numerically stable) logsumexp accumulation across class chunks.
    m_prev = m_sc[...]                                                  # (TR, 1)
    m_new = jnp.maximum(m_prev, jnp.max(x, axis=-1, keepdims=True))     # (TR, 1)
    s_sc[...] = (s_sc[...] * jnp.exp(m_prev - m_new)
                 + jnp.sum(jnp.exp(x - m_new), axis=-1, keepdims=True))
    m_sc[...] = m_new
    tsum_sc[...] = tsum_sc[...] + jnp.sum(t, axis=-1, keepdims=True)
    txsum_sc[...] = txsum_sc[...] + jnp.sum(t * x, axis=-1, keepdims=True)

    @pl.when(k == nk - 1)
    def _finalize():
        lse = m_sc[...] + jnp.log(s_sc[...])
        loss_ref[...] = lse * tsum_sc[...] - txsum_sc[...]              # (TR, 1)


def _vmem_budget():
    """(per-input block byte target, vmem_limit_bytes) per TPU generation."""
    kind = ""
    try:
        kind = jax.devices()[0].device_kind.lower()
    except Exception:
        pass
    if "v2" in kind or "v3" in kind:
        return 1 * 1024 * 1024, 12 * 1024 * 1024    # 16 MiB physical VMEM
    if "v4" in kind or "v5" in kind or "v6" in kind:
        return 6 * 1024 * 1024, 96 * 1024 * 1024    # 128 MiB physical VMEM
    # v7x (64 MiB physical VMEM) and unknown chips: stay conservative.
    return 3 * 1024 * 1024, 48 * 1024 * 1024


def _divisors(q):
    ds = set()
    d = 1
    while d * d <= q:
        if q % d == 0:
            ds.add(d)
            ds.add(q // d)
        d += 1
    return sorted(ds)


def _largest_divisor_multiple(val, multiple_of, cap):
    """Largest divisor of `val` that is a multiple of `multiple_of` and <= cap."""
    best = None
    for d in _divisors(val):
        if d % multiple_of == 0 and d <= cap:
            best = d
    return best


def _pick_row_block(n, row_cap):
    """Largest tr (multiple of 8, exactly dividing the 8-aligned prefix of n) that
    fits row_cap, preferring >= 2 row blocks so the 'parallel' axis can span both
    TensorCores on megacore parts."""
    q = n // 8
    if q == 0:
        return 0, 0
    cap_d = max(1, row_cap // 8)
    ds = [d for d in _divisors(q) if d <= cap_d]
    multi = [d for d in ds if q // d >= 2]
    d = max(multi) if multi else max(ds)
    return 8 * d, 8 * q  # (tr, prefix rows n0)


def maxup_cross_entropy_loss(inputs, targets, m, *, block_rows=None, block_cols=None):
    """JAX/Pallas equivalent of MaxupCrossEntropyLoss(m).forward(inputs, targets).

    inputs : (B*m, C) logits (f32 or bf16).
    targets: soft labels with B*m*C elements, leading dim B (any dtype; bf16 for
             both operands halves HBM traffic — compute is f32 in-kernel).
    """
    batch_size = targets.shape[0]
    n, c = inputs.shape
    assert n == batch_size * m, "input rows must equal batch_size * m"
    t2 = targets.reshape(n, c)  # layout-compatible reshape: no HBM copy

    # Budget per-input block bytes by the *widest* operand dtype.
    itemsize = max(jnp.dtype(inputs.dtype).itemsize, jnp.dtype(t2.dtype).itemsize)
    blk_bytes, vmem_limit = _vmem_budget()
    blk_elems = max(8 * 128, blk_bytes // itemsize)

    # Class-chunk width (large-C path). tc == c means a single chunk.
    if block_cols is not None:
        assert c % block_cols == 0, "block_cols must divide the class dimension"
        tc = block_cols
    elif 8 * c <= blk_elems:
        tc = c
    else:
        tc = _largest_divisor_multiple(c, 128, max(128, blk_elems // 8)) or c
        # TODO(synk): if C is vocab-scale with no 128-multiple divisor, pad C once
        # in the producer (logits with a large negative constant, targets with 0).

    # Row-block height: multiple of 8, exact divisor of the 8-aligned prefix of N.
    row_cap = max(8, (blk_elems // tc) // 8 * 8)
    if block_rows is not None:
        row_cap = max(8, (block_rows // 8) * 8)
    tr, n0 = _pick_row_block(n, row_cap)

    # TODO(synk): training use needs a jax.custom_vjp (forward-only here, per the
    # module spec); dL/dx = (softmax(x)*sum(t) - t)/B masked to each group's argmax row.
    # TODO(synk): for one-hot targets a label-index fast path (loss = lse - x[label])
    # would skip the (N, C) target read entirely (~2x fewer HBM bytes).

    losses = []
    if n0 > 0:
        prefix_loss = pl.pallas_call(
            _soft_ce_kernel,
            out_shape=jax.ShapeDtypeStruct((n0, 1), jnp.float32),
            grid_spec=pltpu.PrefetchScalarGridSpec(
                num_scalar_prefetch=0,
                grid=(n0 // tr, c // tc),  # rows parallel, class chunks innermost
                in_specs=[
                    pl.BlockSpec((tr, tc), lambda i, k: (i, k)),
                    pl.BlockSpec((tr, tc), lambda i, k: (i, k)),
                ],
                out_specs=pl.BlockSpec((tr, 1), lambda i, k: (i, 0)),
                scratch_shapes=[pltpu.VMEM((tr, 1), jnp.float32)] * 4,
            ),
            compiler_params=pltpu.CompilerParams(
                dimension_semantics=("parallel", "arbitrary"),
                vmem_limit_bytes=vmem_limit,
            ),
        )(inputs, t2)  # full arrays passed; the grid only touches the prefix rows
        losses.append(prefix_loss[:, 0])

    if n0 < n:
        # Ragged tail (< 8 rows): tiny, pure JAX (avoids any full-array pad copy).
        x_t = inputs[n0:].astype(jnp.float32)
        t_t = t2[n0:].astype(jnp.float32)
        lse = jax.nn.logsumexp(x_t, axis=1)
        losses.append(lse * jnp.sum(t_t, axis=1) - jnp.sum(t_t * x_t, axis=1))

    row_loss = losses[0] if len(losses) == 1 else jnp.concatenate(losses)

    # Maxup epilogue (N scalars, tiny): worst loss over the m augmentations per
    # example, then mean over the batch.
    group_loss = jnp.max(row_loss.reshape(batch_size, m), axis=1)
    return jnp.mean(group_loss)


def _reference(inputs, targets, m):
    """Pure-JAX reference mirroring the PyTorch forward."""
    batch_size = targets.shape[0]
    x = inputs.astype(jnp.float32)
    t = targets.reshape(x.shape).astype(jnp.float32)
    logp = jax.nn.log_softmax(x, axis=1)
    loss = jnp.sum(-t * logp, axis=1)
    return jnp.mean(jnp.max(loss.reshape(batch_size, m), axis=1))


if __name__ == "__main__":
    root = jax.random.PRNGKey(0)

    def check(idx, B, M, C, dtype=jnp.float32, block_rows=None, block_cols=None):
        k1, k2 = jax.random.split(jax.random.fold_in(root, idx))
        logits = jax.random.normal(k1, (B * M, C), dtype=jnp.float32).astype(dtype)
        targets = jax.nn.softmax(
            2.0 * jax.random.normal(k2, (B, M, C), dtype=jnp.float32), axis=-1
        ).astype(dtype)
        got = jax.block_until_ready(
            maxup_cross_entropy_loss(
                logits, targets, M, block_rows=block_rows, block_cols=block_cols))
        want = _reference(logits, targets, M)
        tol = 2e-5 if dtype == jnp.float32 else 1e-3
        if not bool(jnp.allclose(got, want, rtol=tol, atol=tol)):
            raise AssertionError(
                f"case {idx}: B={B} M={M} C={C} dtype={dtype}: pallas={got} ref={want}")

    # Small canonical config (single row block, single class chunk).
    check(0, 2, 4, 32)
    # Multi row-block grid: n=40 -> 5 x 8-row blocks, no padding needed.
    check(1, 10, 4, 128, block_rows=16)
    # Class-chunked online-logsumexp path: C=256 split into 2 x 128 chunks.
    check(2, 4, 2, 256, block_cols=128)
    # Ragged N (n=9): 8-row kernel prefix + 1-row pure-JAX tail, groups of m=3.
    check(3, 3, 3, 64)
    # bf16 logits + targets (half the HBM traffic; f32 compute inside the kernel).
    check(4, 2, 4, 32, dtype=jnp.bfloat16)

    print("KERNEL_OK")
</pallas_src>

<mosaic_0001>
module attributes {stable_mosaic.version = 11 : i64} {
  func.func @_soft_ce_kernel(%arg0: i32, %arg1: i32, %arg2: memref<8x32xf32, #tpu.memory_space<vmem>>, %arg3: memref<8x32xf32, #tpu.memory_space<vmem>>, %arg4: memref<8x1xf32, #tpu.memory_space<vmem>>, %arg5: memref<8x1xf32, #tpu.memory_space<vmem>>, %arg6: memref<8x1xf32, #tpu.memory_space<vmem>>, %arg7: memref<8x1xf32, #tpu.memory_space<vmem>>, %arg8: memref<8x1xf32, #tpu.memory_space<vmem>>) attributes {dimension_semantics = [#tpu.dimension_semantics<parallel>, #tpu.dimension_semantics<arbitrary>], iteration_bounds = array<i64: 1, 1>, scalar_prefetch = 0 : i64, scratch_operands = 4 : i64, tpu.core_type = #tpu.core_type<tc>, window_params = [{transform_indices = @transform_0, window_bounds = array<i64: 8, 32>}, {transform_indices = @transform_1, window_bounds = array<i64: 8, 32>}, {transform_indices = @transform_2, window_bounds = array<i64: 8, 1>}]} {
    %c0_i32 = arith.constant 0 : i32
    %0 = arith.cmpi eq, %arg1, %c0_i32 : i32
    %1 = arith.extui %0 : i1 to i32
    %c0_i32_0 = arith.constant 0 : i32
    %2 = arith.cmpi ne, %1, %c0_i32_0 : i32
    scf.if %2 {
      %cst_25 = arith.constant 0xFF800000 : f32
      %35 = vector.broadcast %cst_25 : f32 to vector<8x1xf32>
      %c0_26 = arith.constant 0 : index
      %c0_27 = arith.constant 0 : index
      %36 = vector.load %arg5[%c0_26, %c0_27] : memref<8x1xf32, #tpu.memory_space<vmem>>, vector<8x1xf32>
      tpu.vector_store %arg5[%c0_26, %c0_27], %35 {strides = array<i32>} : memref<8x1xf32, #tpu.memory_space<vmem>>, vector<8x1xf32>,
      %cst_28 = arith.constant 0.000000e+00 : f32
      %37 = vector.broadcast %cst_28 : f32 to vector<8x1xf32>
      %c0_29 = arith.constant 0 : index
      %c0_30 = arith.constant 0 : index
      %38 = vector.load %arg6[%c0_29, %c0_30] : memref<8x1xf32, #tpu.memory_space<vmem>>, vector<8x1xf32>
      tpu.vector_store %arg6[%c0_29, %c0_30], %37 {strides = array<i32>} : memref<8x1xf32, #tpu.memory_space<vmem>>, vector<8x1xf32>,
      %cst_31 = arith.constant 0.000000e+00 : f32
      %39 = vector.broadcast %cst_31 : f32 to vector<8x1xf32>
      %c0_32 = arith.constant 0 : index
      %c0_33 = arith.constant 0 : index
      %40 = vector.load %arg7[%c0_32, %c0_33] : memref<8x1xf32, #tpu.memory_space<vmem>>, vector<8x1xf32>
      tpu.vector_store %arg7[%c0_32, %c0_33], %39 {strides = array<i32>} : memref<8x1xf32, #tpu.memory_space<vmem>>, vector<8x1xf32>,
      %cst_34 = arith.constant 0.000000e+00 : f32
      %41 = vector.broadcast %cst_34 : f32 to vector<8x1xf32>
      %c0_35 = arith.constant 0 : index
      %c0_36 = arith.constant 0 : index
      %42 = vector.load %arg8[%c0_35, %c0_36] : memref<8x1xf32, #tpu.memory_space<vmem>>, vector<8x1xf32>
      tpu.vector_store %arg8[%c0_35, %c0_36], %41 {strides = array<i32>} : memref<8x1xf32, #tpu.memory_space<vmem>>, vector<8x1xf32>,
    } else {
    }
    %c0 = arith.constant 0 : index
    %c0_1 = arith.constant 0 : index
    %3 = vector.load %arg2[%c0, %c0_1] : memref<8x32xf32, #tpu.memory_space<vmem>>, vector<8x32xf32>
    %c0_2 = arith.constant 0 : index
    %c0_3 = arith.constant 0 : index
    %4 = vector.load %arg3[%c0_2, %c0_3] : memref<8x32xf32, #tpu.memory_space<vmem>>, vector<8x32xf32>
    %c0_4 = arith.constant 0 : index
    %c0_5 = arith.constant 0 : index
    %5 = vector.load %arg5[%c0_4, %c0_5] : memref<8x1xf32, #tpu.memory_space<vmem>>, vector<8x1xf32>
    %cst = arith.constant dense<0xFF800000> : vector<8xf32>
    %6 = vector.multi_reduction <maximumf>, %3, %cst [1] : vector<8x32xf32> to vector<8xf32>
    %7 = vector.shape_cast %6 : vector<8xf32> to vector<8x1xf32>
    %8 = arith.maximumf %5, %7 : vector<8x1xf32>
    %c0_6 = arith.constant 0 : index
    %c0_7 = arith.constant 0 : index
    %9 = vector.load %arg6[%c0_6, %c0_7] : memref<8x1xf32, #tpu.memory_space<vmem>>, vector<8x1xf32>
    %10 = arith.subf %5, %8 : vector<8x1xf32>
    %11 = math.exp %10 : vector<8x1xf32>
    %12 = arith.mulf %9, %11 : vector<8x1xf32>
    %13 = vector.broadcast %8 : vector<8x1xf32> to vector<8x32xf32>
    %14 = arith.subf %3, %13 : vector<8x32xf32>
    %15 = math.exp %14 : vector<8x32xf32>
    %cst_8 = arith.constant dense<0.000000e+00> : vector<8xf32>
    %16 = vector.multi_reduction <add>, %15, %cst_8 [1] : vector<8x32xf32> to vector<8xf32>
    %17 = vector.shape_cast %16 : vector<8xf32> to vector<8x1xf32>
    %18 = arith.addf %12, %17 : vector<8x1xf32>
    %c0_9 = arith.constant 0 : index
    %c0_10 = arith.constant 0 : index
    %19 = vector.load %arg6[%c0_9, %c0_10] : memref<8x1xf32, #tpu.memory_space<vmem>>, vector<8x1xf32>
    tpu.vector_store %arg6[%c0_9, %c0_10], %18 {strides = array<i32>} : memref<8x1xf32, #tpu.memory_space<vmem>>, vector<8x1xf32>,
    %c0_11 = arith.constant 0 : index
    %c0_12 = arith.constant 0 : index
    %20 = vector.load %arg5[%c0_11, %c0_12] : memref<8x1xf32, #tpu.memory_space<vmem>>, vector<8x1xf32>
    tpu.vector_store %arg5[%c0_11, %c0_12], %8 {strides = array<i32>} : memref<8x1xf32, #tpu.memory_space<vmem>>, vector<8x1xf32>,
    %c0_13 = arith.constant 0 : index
    %c0_14 = arith.constant 0 : index
    %21 = vector.load %arg7[%c0_13, %c0_14] : memref<8x1xf32, #tpu.memory_space<vmem>>, vector<8x1xf32>
    %cst_15 = arith.constant dense<0.000000e+00> : vector<8xf32>
    %22 = vector.multi_reduction <add>, %4, %cst_15 [1] : vector<8x32xf32> to vector<8xf32>
    %23 = vector.shape_cast %22 : vector<8xf32> to vector<8x1xf32>
    %24 = arith.addf %21, %23 : vector<8x1xf32>
    %c0_16 = arith.constant 0 : index
    %c0_17 = arith.constant 0 : index
    %25 = vector.load %arg7[%c0_16, %c0_17] : memref<8x1xf32, #tpu.memory_space<vmem>>, vector<8x1xf32>
    tpu.vector_store %arg7[%c0_16, %c0_17], %24 {strides = array<i32>} : memref<8x1xf32, #tpu.memory_space<vmem>>, vector<8x1xf32>,
    %c0_18 = arith.constant 0 : index
    %c0_19 = arith.constant 0 : index
    %26 = vector.load %arg8[%c0_18, %c0_19] : memref<8x1xf32, #tpu.memory_space<vmem>>, vector<8x1xf32>
    %27 = arith.mulf %4, %3 : vector<8x32xf32>
    %cst_20 = arith.constant dense<0.000000e+00> : vector<8xf32>
    %28 = vector.multi_reduction <add>, %27, %cst_20 [1] : vector<8x32xf32> to vector<8xf32>
    %29 = vector.shape_cast %28 : vector<8xf32> to vector<8x1xf32>
    %30 = arith.addf %26, %29 : vector<8x1xf32>
    %c0_21 = arith.constant 0 : index
    %c0_22 = arith.constant 0 : index
    %31 = vector.load %arg8[%c0_21, %c0_22] : memref<8x1xf32, #tpu.memory_space<vmem>>, vector<8x1xf32>
    tpu.vector_store %arg8[%c0_21, %c0_22], %30 {strides = array<i32>} : memref<8x1xf32, #tpu.memory_space<vmem>>, vector<8x1xf32>,
    %c0_i32_23 = arith.constant 0 : i32
    %32 = arith.cmpi eq, %arg1, %c0_i32_23 : i32
    %33 = arith.extui %32 : i1 to i32
    %c0_i32_24 = arith.constant 0 : i32
    %34 = arith.cmpi ne, %33, %c0_i32_24 : i32
    scf.if %34 {
      %c0_25 = arith.constant 0 : index
      %c0_26 = arith.constant 0 : index
      %35 = vector.load %arg5[%c0_25, %c0_26] : memref<8x1xf32, #tpu.memory_space<vmem>>, vector<8x1xf32>
      %c0_27 = arith.constant 0 : index
      %c0_28 = arith.constant 0 : index
      %36 = vector.load %arg6[%c0_27, %c0_28] : memref<8x1xf32, #tpu.memory_space<vmem>>, vector<8x1xf32>
      %37 = math.log %36 : vector<8x1xf32>
      %38 = arith.addf %35, %37 : vector<8x1xf32>
      %c0_29 = arith.constant 0 : index
      %c0_30 = arith.constant 0 : index
      %39 = vector.load %arg7[%c0_29, %c0_30] : memref<8x1xf32, #tpu.memory_space<vmem>>, vector<8x1xf32>
      %40 = arith.mulf %38, %39 : vector<8x1xf32>
      %c0_31 = arith.constant 0 : index
      %c0_32 = arith.constant 0 : index
      %41 = vector.load %arg8[%c0_31, %c0_32] : memref<8x1xf32, #tpu.memory_space<vmem>>, vector<8x1xf32>
      %42 = arith.subf %40, %41 : vector<8x1xf32>
      %c0_33 = arith.constant 0 : index
      %c0_34 = arith.constant 0 : index
      %43 = vector.load %arg4[%c0_33, %c0_34] : memref<8x1xf32, #tpu.memory_space<vmem>>, vector<8x1xf32>
      tpu.vector_store %arg4[%c0_33, %c0_34], %42 {strides = array<i32>} : memref<8x1xf32, #tpu.memory_space<vmem>>, vector<8x1xf32>,
    } else {
    }
    return
  }
  func.func @transform_0(%arg0: i32, %arg1: i32) -> (i32, i32) {
    %c0_i32 = arith.constant 0 : i32
    return %arg0, %arg1 : i32, i32
  }
  func.func @transform_1(%arg0: i32, %arg1: i32) -> (i32, i32) {
    %c0_i32 = arith.constant 0 : i32
    return %arg0, %arg1 : i32, i32
  }
  func.func @transform_2(%arg0: i32, %arg1: i32) -> (i32, i32) {
    %c0_i32 = arith.constant 0 : i32
    %c0_i32_0 = arith.constant 0 : i32
    return %arg0, %c0_i32 : i32, i32
  }
}

</mosaic_0001>

<bundles_post_ra>
// kernel: tpu_custom_call.1
= control target key start
LH: loop header
LB: loop body
LE: loop exit
PB: predicated region body
PF: predicated region fallthrough
CT: control target
= control target key end

     0   :  { %7 = vsyncpa [#allocation7], 0  ;;  %s214_s0 = inlined_call_operand.hbm [shape: f32[8,32], index: 0, kind: input, shape index: {}]   ;;  %s215_s1 = inlined_call_operand.hbm [shape: f32[8,32], index: 1, kind: input, shape index: {}]   ;;  %s216_s2 = inlined_call_operand.vmem [shape: f32[8,1], index: 2, kind: output, shape index: {}]  }
   0x1   :  { %s14_s11 = sshll.u32 %s214_s0, 4  ;;  %s15_s11 = int_to_ptr.hbm [resolvable:$true] %s14_s11 }
   0x2   :  { %8 = vsyncpa [#allocation9], 0  ;;  %s172_s12 = smov [#allocation6]   ;;  %s25_s16 = sshll.u32 %s215_s1, 4  ;;  %s26_s16 = int_to_ptr.hbm [resolvable:$true] %s25_s16 }
   0x3   :  { %s16_s13 = sshll.u32 %s172_s12, 4  ;;  %s173_s17 = smov [#allocation8]   ;;  %s17_s13 = int_to_ptr.vmem [resolvable:$true] %s16_s13 }
   0x4   :  { %19 = dma.hbm_to_vmem [thread:$0]  %s15_s11, 128, %s17_s13, [#allocation7]  }
   0x5   :  { %s27_s18 = sshll.u32 %s173_s17, 4  ;;  %s28_s18 = int_to_ptr.vmem [resolvable:$true] %s27_s18 }
   0x6   :  { %30 = dma.hbm_to_vmem [thread:$0]  %s26_s16, 128, %s28_s18, [#allocation9]  }
   0x7   :  { %168 = dma.done.wait [#allocation7], 128  }
   0x8   :  { %169 = vsyncadd [#allocation7], 4294967168 }
   0x9   :  { %170 = dma.done.wait [#allocation9], 128  }
   0xa   :  { %171 = vsyncadd [#allocation9], 4294967168  ;;  %vm43_vm0 = vcmask 7168   ;;  %v174_v0 = vmov -inf   ;;  %vm51_vm1 = vcmask 261120   ;;  %v48_v1 = vld [vmem:[#allocation6] sm:$0xff] }
   0xb   :  { %44 = vst.msk [vmem:[#allocation2] sm:$0xff] %vm43_vm0, %v174_v0  ;;  %v52_v2 = vsel %vm51_vm1, %v48_v1, -inf  ;;  %v175_v3 = vmov 0   ;;  %v176_v4 = vmov 0.0   ;;  %v49_v9 = vld [vmem:[#allocation8] sm:$0xff] }
   0xc   :  { %53 = vmax.xlane.f32.xlu0 %v52_v2  ;;  %45 = vst.msk [vmem:[#allocation3] sm:$0xff] %vm43_vm0, %v176_v4  ;;  %v83_v10 = vmul.f32 %v49_v9, %v48_v1  ;;  %v77_v17 = vsel %vm51_vm1, %v49_v9, 0.0 }
   0xd   :  { %113 = vset.pattern.permute.xlu0 %v175_v3  ;;  %46 = vst.msk [vmem:[#allocation4] sm:$0xff] %vm43_vm0, %v176_v4 }
   0xe   :  { %47 = vst.msk [vmem:[#allocation5] sm:$0xff] %vm43_vm0, %v176_v4  ;;  %v84_v11 = vsel %vm51_vm1, %v83_v10, 0.0 }
   0xf   :  { %85 = vadd.xlane.f32.xlu2 %v84_v11 }
  0x12   :  { %v50_v5 = vld [vmem:[#allocation2] sm:$0xff] }
  0x13   :  { %v56_v23 = vld [vmem:[#allocation3] sm:$0xff] }
  0x14   :  { %v76_v27 = vld [vmem:[#allocation4] sm:$0xff] }
  0x15   :  { %v82_v19 = vld [vmem:[#allocation5] sm:$0xff] }
  0x7f   :  { %v54_v6 = vpop.xlane.xlu0 %53 }
  0x80   :  { %v55_v7 = vmax.f32 %v50_v5, %v54_v6 }
  0x82   :  { %v57_v8 = vsub.f32 %v50_v5, %v55_v7  ;;  %75 = vst.msk [vmem:[#allocation2] sm:$0xff] %vm43_vm0, %v55_v7  ;;  %63 = vperm.xlu0 %113, %v55_v7   ;;  %v86_v18 = vpop.xlane.xlu2 %85 }
  0x83   :  { %v87_v20 = vadd.f32 %v86_v18, %v82_v19 }
  0x84   :  { %v58_v21 = vmul.f32 1.442695, %v57_v8 }
  0x85   :  { %88 = vst.msk [vmem:[#allocation5] sm:$0xff] %vm43_vm0, %v87_v20 }
  0x89   :  { %v92_v33 = vld [vmem:[#allocation2] sm:$0xff] }
  0x8c   :  { %v99_v36 = vld [vmem:[#allocation5] sm:$0xff] }
  0xf4   :  { %v64_v12 = vpop.permute.xlu0 %63 }
  0xf5   :  { %v66_v13 = vsub.f32 %v48_v1, %v64_v12 }
  0xf7   :  { %v67_v14 = vmul.f32 1.442695, %v66_v13 }
  0xf9   :  { %114 = vpow2.f32 %v67_v14 }
  0xfa   :  { %116 = vpow2.f32 %v58_v21 }
  0xff   :  { %v115_v15 = vpop.eup %114 }
 0x100   :  { %v69_v16 = vsel %vm51_vm1, %v115_v15, 0.0  ;;  %v117_v22 = vpop.eup %116 }
 0x101   :  { %70 = vadd.xlane.f32.xlu1 %v69_v16  ;;  %v60_v24 = vmul.f32 %v117_v22, %v56_v23 }
 0x109   :  { %78 = vadd.xlane.f32.xlu1 %v77_v17 }
 0x174   :  { %v71_v25 = vpop.xlane.xlu1 %70 }
 0x175   :  { %v72_v26 = vadd.f32 %v71_v25, %v60_v24 }
 0x177   :  { %74 = vst.msk [vmem:[#allocation3] sm:$0xff] %vm43_vm0, %v72_v26 }
 0x17c   :  { %v79_v28 = vpop.xlane.xlu1 %78 }
 0x17d   :  { %v80_v29 = vadd.f32 %v79_v28, %v76_v27 }
 0x17e   :  { %v93_v30 = vld [vmem:[#allocation3] sm:$0xff] }
 0x17f   :  { %118 = vlog2.f32 %v93_v30  ;;  %81 = vst.msk [vmem:[#allocation4] sm:$0xff] %vm43_vm0, %v80_v29 }
 0x185   :  { %v119_v31 = vpop.eup %118 }
 0x186   :  { %v95_v32 = vmul.f32 0.6931472, %v119_v31  ;;  %v97_v34 = vld [vmem:[#allocation4] sm:$0xff] }
 0x188   :  { %v96_v35 = vadd.f32 %v95_v32, %v92_v33 }
 0x18a   :  { %v98_v37 = vmul.f32 %v97_v34, %v96_v35 }
 0x18c   :  { %v100_v38 = vsub.f32 %v98_v37, %v99_v36 }
 0x18e   :  { %101 = vst.msk [vmem:[%s216_s2] sm:$0xff] %vm43_vm0, %v100_v38 }
 0x18f   :  { %106 = vsyncpa [#allocation7], 1 }
 0x190   :  { %107 = vsyncpa [#allocation9], 1 }

</bundles_post_ra>
